<compile_context>
chip_gen: v7x
topology: tpu7x:2x2x1
jax: 0.10.0
libtpu: 0.0.40
codegen_flags: <defaults>
</compile_context>

<pallas_src>
import functools
import math

import jax
import jax.numpy as jnp
from jax import lax
from jax.experimental import pallas as pl
from jax.experimental.pallas import tpu as pltpu

LEAKY_SLOPE = 0.2
COMPUTE_DTYPE = jnp.bfloat16          # MXU inputs / inter-layer activations


def _tpu_defaults():
    """(max_tl, vmem_limit_bytes, split_taps, megacore) per TPU generation."""
    try:
        kind = jax.devices()[0].device_kind.lower()
    except Exception:
        kind = ""
    if "v7" in kind:
        # 64 MiB VMEM/TC, MRB accumulates matmul results, 2 TCs per chip.
        return 512, 48 * 1024 * 1024, True, True
    if "v4" in kind or "v5p" in kind:
        # 128 MiB VMEM, megacore (2 TCs presented as one device).
        return 1024, 96 * 1024 * 1024, False, True
    if "v5" in kind or "v6" in kind or "trillium" in kind:
        # v5e / v6e: 128 MiB VMEM, single TensorCore.
        return 1024, 96 * 1024 * 1024, False, False
    return 512, 48 * 1024 * 1024, False, False


MAX_TL, VMEM_LIMIT_BYTES, SPLIT_TAPS, MEGACORE = _tpu_defaults()


def _leaky(v):
    return jnp.where(v >= 0, v, LEAKY_SLOPE * v)


def _round_up(v, m):
    return -(-v // m) * m


# ----------------------------------------------------------------------------
# Parameter packing (all weight re-layout hoisted out of the forward pass).
# ----------------------------------------------------------------------------
def pack_conv(p, cd):
    """Raw {'w':(Cout,Cin,K),'b':(Cout,)} -> {'wt':(Cout,K,Cin) cd, 'b2':(Cout,1) f32}."""
    w, b = p["w"], p["b"]
    Cout, _, _ = w.shape
    return {"wt": jnp.transpose(w, (0, 2, 1)).astype(cd),
            "b2": b.reshape(Cout, 1).astype(jnp.float32)}


def pack_strided_conv(p, stride, cd):
    """Polyphase (space-to-channel) fold of a strided conv's weights:
    w[o, c, q*s + r] -> w_fold[o, q, r*Cin + c]; paired with the input fold
    x[b, c, m*s + r] -> x_fold[b, r*Cin + c, m] the strided conv becomes a
    stride-1 conv with K' = ceil(K/s), Cin' = s*Cin (deeper MXU contraction)."""
    w, b = p["w"], p["b"]
    Cout, Cin, K = w.shape
    s = stride
    Kq = -(-K // s)
    wp = jnp.pad(w, ((0, 0), (0, 0), (0, Kq * s - K)))
    wf = wp.reshape(Cout, Cin, Kq, s)
    wf = jnp.transpose(wf, (0, 3, 1, 2)).reshape(Cout, s * Cin, Kq)   # OIH folded
    return pack_conv({"w": wf, "b": b}, cd)


# ----------------------------------------------------------------------------
# Pallas kernel: tiled Conv1d (stride 1) with fused prologue / epilogues.
# ----------------------------------------------------------------------------
def _conv_kernel(*refs, K, dil, TL, BB, Cin, Lout, has_halo, vpu_path,
                 split_taps, pre_leaky, has_res, epilogue, extra_film,
                 has_head1, center):
    it = iter(refs)
    xm_ref = next(it)                                   # (BB, Cin, TL[+H])
    xh_ref = next(it) if has_halo else None             # (BB, 1, Cin, H)
    w_ref = next(it)                                    # (Cout, K*Cin)
    b_ref = next(it)                                    # (Cout, 1) f32
    w1_ref = next(it) if has_head1 else None            # (C1, Cin)
    b1_ref = next(it) if has_head1 else None            # (C1, 1) f32
    res_ref = next(it) if has_res else None             # (BB, Cout, TL)
    need_film = (epilogue == "film") or extra_film
    film_ref = next(it) if need_film else None          # (BB, 2*Cout, TL)
    pos_ref = next(it) if epilogue == "leaky_pos" else None  # (Cout, 1) f32
    out_ref = next(it)                                  # (BB, Cout, TL)
    out1_ref = next(it) if has_head1 else None
    out2_ref = next(it) if extra_film else None

    # Lane mask: zero lanes >= Lout so the padded (NT*TL) output can be fed to
    # downstream convs / residual / FiLM inputs without any HBM re-slicing.
    valid = Lout - pl.program_id(1) * TL
    mask = lax.broadcasted_iota(jnp.int32, (1, TL), 1) < valid

    for bb in range(BB):
        win = xm_ref[bb]                                # (Cin, TL or TL+H)
        if has_halo:
            win = jnp.concatenate([win, xh_ref[bb, 0]], axis=-1)

        # Fused 1x1 head (UBlock.block1) on the raw (pre-activation) window.
        if has_head1:
            xc = lax.slice_in_dim(win, center, center + TL, axis=1)
            y1 = jnp.dot(w1_ref[...], xc, preferred_element_type=jnp.float32)
            y1 = y1 + b1_ref[...]
            out1_ref[bb] = jnp.where(mask, y1, 0.0).astype(out1_ref.dtype)

        # Leaky applied ONCE per loaded window (leaky(0)=0, so doing it after
        # zero-padding matches the PyTorch pre-conv activation).
        if pre_leaky:
            win = _leaky(win)

        if vpu_path:
            # Cin == 1: K-tap broadcast FMA on the VPU, fully in f32.
            win = win.astype(jnp.float32)
            w = w_ref[...].astype(jnp.float32)          # (Cout, K)
            y = None
            for k in range(K):
                tap = lax.slice_in_dim(win, k * dil, k * dil + TL, axis=1)
                term = w[:, k:k + 1] * tap
                y = term if y is None else y + term
        elif K == 1:
            y = jnp.dot(w_ref[...], lax.slice_in_dim(win, 0, TL, axis=1),
                        preferred_element_type=jnp.float32)
        elif split_taps:
            # v7x: MRB accumulates partial matmuls in place; avoids the
            # (K*Cin, TL) concat copy feeding the MXU.
            y = None
            for k in range(K):
                tap = lax.slice_in_dim(win, k * dil, k * dil + TL, axis=1)
                part = jnp.dot(w_ref[:, k * Cin:(k + 1) * Cin], tap,
                               preferred_element_type=jnp.float32)
                y = part if y is None else y + part
        else:
            taps = [lax.slice_in_dim(win, k * dil, k * dil + TL, axis=1)
                    for k in range(K)]
            xk = jnp.concatenate(taps, axis=0)          # (K*Cin, TL)
            y = jnp.dot(w_ref[...], xk, preferred_element_type=jnp.float32)
        y = y + b_ref[...]

        if has_res:
            y = y + res_ref[bb].astype(jnp.float32)

        if need_film:
            filmv = film_ref[bb]                        # (2C, TL) = [shift; scale]
            C = filmv.shape[0] // 2
            shift = filmv[:C].astype(jnp.float32)
            scale = filmv[C:].astype(jnp.float32)

        if epilogue == "film":
            y = _leaky(shift + scale * y)
        elif epilogue == "leaky_pos":
            y = _leaky(y) + pos_ref[...]

        out_ref[bb] = jnp.where(mask, y, 0.0).astype(out_ref.dtype)
        if extra_film:
            y2 = _leaky(shift + scale * y)
            out2_ref[bb] = jnp.where(mask, y2, 0.0).astype(out2_ref.dtype)


# ----------------------------------------------------------------------------
# Wrappers
# ----------------------------------------------------------------------------
def conv1d(x, pp, *, dilation=1, padding=0, pre_leaky=False, residual=None,
           film=None, pos=None, epilogue=None, extra_film_out=False,
           head1x1=None, in_len=None, trim=True):
    """PyTorch-semantics stride-1 Conv1d (B,Cin,L)->(B,Cout,Lout), fused extras.

    The input may be physically longer than its logical length `in_len`; any
    lanes >= in_len must be zero (outputs of this kernel satisfy that).
    With trim=False the output stays in the padded (B, Cout, NT*TL) layout
    with lanes >= Lout zeroed in-kernel, so it can feed the next conv / the
    residual / FiLM inputs without per-layer HBM pad+slice round-trips.

    epilogue: None | "film" (leaky(shift+scale*y)) | "leaky_pos" (leaky(y)+pos)
    residual: (B, Cout, Lout or NTL) added before the epilogue
    film:     (B, 2*Cout, Lout or NTL) channel-concatenated [shift; scale]
    head1x1:  packed 1x1 conv evaluated on the raw (non-activated) window
    extra_film_out: also emit leaky(shift + scale * result) as a second output
    """
    assert epilogue in (None, "film", "leaky_pos")
    wt3, b2 = pp["wt"], pp["b2"]
    Cout, K, Cin = wt3.shape
    cd = wt3.dtype
    B, Cin_x, Lphys = x.shape
    assert Cin_x == Cin, (Cin_x, Cin)
    L = Lphys if in_len is None else in_len
    assert L <= Lphys
    H = (K - 1) * dilation
    Lout = L + 2 * padding - H
    assert Lout >= 1

    if Lout <= MAX_TL:
        TL, NT = _round_up(max(Lout, 128), 128), 1      # lane-dense single tile
    else:
        TL, NT = MAX_TL, -(-Lout // MAX_TL)
    NTL = NT * TL

    # Fold the whole batch into one grid cell on single-tile layers (per-step
    # overhead dominated); keep grid=(B,1) on megacore parts for core balance.
    fold_batch = (NT == 1) and (B <= 8) and not (MEGACORE and B > 1)
    BB = B if fold_batch else 1
    GB = B // BB

    xc = x.astype(cd)
    # Conv zero-padding on the left; tile + halo round-up on the right.  Lanes
    # of x beyond its logical length are zero, so they double as right padding.
    target = NTL + H
    avail = padding + Lphys
    if avail >= target:
        xp = jnp.pad(xc, ((0, 0), (0, 0), (padding, 0)))[:, :, :target]
    else:
        xp = jnp.pad(xc, ((0, 0), (0, 0), (padding, target - avail)))

    wt = wt3.reshape(Cout, K * Cin)                     # contiguous (free) reshape

    vpu_path = (Cin == 1)
    has_halo = (NT > 1) and (H > 0)
    has_res = residual is not None
    has_head1 = head1x1 is not None
    need_film = (epilogue == "film") or extra_film_out
    assert (film is not None) == need_film
    if epilogue == "leaky_pos":
        assert pos is not None

    args, in_specs = [], []

    def add(arr, spec):
        args.append(arr)
        in_specs.append(spec)

    if NT == 1:
        add(xp, pl.BlockSpec((BB, Cin, TL + H), lambda bb, jj: (bb, 0, 0)))
    else:
        add(xp[:, :, :NTL],
            pl.BlockSpec((BB, Cin, TL), lambda bb, jj: (bb, 0, jj)))
    if has_halo:
        # TODO(synk): replace the XLA-built halo + in-kernel lane concat with a
        # manual make_async_copy of one contiguous TL+H window (pl.ANY input).
        tail = xp[:, :, TL:]
        tail = jnp.pad(tail, ((0, 0), (0, 0), (0, NTL - tail.shape[-1])))
        halo = tail.reshape(B, Cin, NT, TL)[:, :, :, :H]
        halo = jnp.transpose(halo, (0, 2, 1, 3))        # (B, NT, Cin, H)
        add(halo, pl.BlockSpec((BB, 1, Cin, H), lambda bb, jj: (bb, jj, 0, 0)))

    # Weights / bias: constant index_map -> VMEM resident across the time axis.
    add(wt, pl.BlockSpec((Cout, K * Cin), lambda bb, jj: (0, 0)))
    add(b2, pl.BlockSpec((Cout, 1), lambda bb, jj: (0, 0)))

    C1 = 0
    if has_head1:
        w1t, b1 = head1x1["wt"], head1x1["b2"]          # (C1, 1, Cin), (C1, 1)
        C1 = w1t.shape[0]
        add(w1t.reshape(C1, Cin), pl.BlockSpec((C1, Cin), lambda bb, jj: (0, 0)))
        add(b1, pl.BlockSpec((C1, 1), lambda bb, jj: (0, 0)))

    def fit_t(a):
        # residual / FiLM tensors: accept the padded NTL layout directly
        # (matching producers emit exactly NTL); otherwise pad / slice once.
        a = a.astype(cd)
        if a.shape[-1] == NTL:
            return a
        if a.shape[-1] > NTL:
            return a[:, :, :NTL]
        return jnp.pad(a, ((0, 0), (0, 0), (0, NTL - a.shape[-1])))

    if has_res:
        add(fit_t(residual),
            pl.BlockSpec((BB, Cout, TL), lambda bb, jj: (bb, 0, jj)))
    if need_film:
        add(fit_t(film),
            pl.BlockSpec((BB, 2 * Cout, TL), lambda bb, jj: (bb, 0, jj)))
    if epilogue == "leaky_pos":
        add(pos.reshape(Cout, 1).astype(jnp.float32),
            pl.BlockSpec((Cout, 1), lambda bb, jj: (0, 0)))

    out_shapes = [jax.ShapeDtypeStruct((B, Cout, NTL), cd)]
    out_specs = [pl.BlockSpec((BB, Cout, TL), lambda bb, jj: (bb, 0, jj))]
    if has_head1:
        out_shapes.append(jax.ShapeDtypeStruct((B, C1, NTL), cd))
        out_specs.append(pl.BlockSpec((BB, C1, TL), lambda bb, jj: (bb, 0, jj)))
    if extra_film_out:
        out_shapes.append(jax.ShapeDtypeStruct((B, Cout, NTL), cd))
        out_specs.append(pl.BlockSpec((BB, Cout, TL), lambda bb, jj: (bb, 0, jj)))

    kern = functools.partial(
        _conv_kernel, K=K, dil=dilation, TL=TL, BB=BB, Cin=Cin, Lout=Lout,
        has_halo=has_halo, vpu_path=vpu_path,
        split_taps=(SPLIT_TAPS and not vpu_path), pre_leaky=pre_leaky,
        has_res=has_res, epilogue=epilogue, extra_film=extra_film_out,
        has_head1=has_head1, center=padding)

    single = (len(out_shapes) == 1)
    outs = pl.pallas_call(
        kern,
        grid=(GB, NT),
        in_specs=in_specs,
        out_specs=out_specs[0] if single else tuple(out_specs),
        out_shape=out_shapes[0] if single else tuple(out_shapes),
        compiler_params=pltpu.CompilerParams(
            dimension_semantics=("parallel", "parallel"),
            vmem_limit_bytes=VMEM_LIMIT_BYTES),
    )(*args)

    if single:
        outs = (outs,)
    if trim:
        outs = tuple(o[:, :, :Lout] for o in outs)
    return outs[0] if single else outs


def conv1d_strided(x, pps, *, stride, padding, ksize, in_len=None, trim=True):
    """Strided Conv1d via polyphase (space-to-channel) fold + the stride-1 kernel.
    Weights are already folded at pack time (pack_strided_conv)."""
    s = stride
    B, Cin, Lphys = x.shape
    L = Lphys if in_len is None else in_len
    Cout, Kq, sCin = pps["wt"].shape
    assert sCin == s * Cin and Kq == -(-ksize // s)
    cd = pps["wt"].dtype
    Lout = (L + 2 * padding - ksize) // s + 1
    M = Lout + Kq - 1
    target = M * s
    xc = x.astype(cd)
    avail = padding + Lphys
    if avail >= target:
        xp = jnp.pad(xc, ((0, 0), (0, 0), (padding, 0)))[:, :, :target]
    else:
        xp = jnp.pad(xc, ((0, 0), (0, 0), (padding, target - avail)))
    xf = xp.reshape(B, Cin, M, s)
    xf = jnp.transpose(xf, (0, 3, 1, 2)).reshape(B, s * Cin, M)
    return conv1d(xf, pps, dilation=1, padding=0, trim=trim)


# ----------------------------------------------------------------------------
# Parameter init (deterministic synthetic init; torch's orthogonal_ /
# xavier_uniform_ RNG is not reproduced, biases are zero as in reset_parameters).
# ----------------------------------------------------------------------------
def conv_init(key, cin, cout, k):
    std = math.sqrt(2.0 / (cin * k + cout * k))
    w = std * jax.random.normal(key, (cout, cin, k), jnp.float32)
    b = jnp.zeros((cout,), jnp.float32)
    return {"w": w, "b": b}


def sinusoidal_pos_embs(dim, max_iter, scale=5000.0):
    dim_h = dim // 2
    pos = jnp.linspace(0.0, scale, max_iter)
    div = jnp.exp(-math.log(10000.0) *
                  jnp.arange(dim_h, dtype=jnp.float32) / dim_h)
    p = pos[:, None] * div[None, :]
    return jnp.concatenate([jnp.sin(p), jnp.cos(p)], axis=-1)   # (max_iter, dim)


def dblock_init(key, input_size, hidden_size, factor):
    ks = jax.random.split(key, 6)
    ksz = factor // 2 * 2 + 1
    return {
        "residual_dense": conv_init(ks[0], input_size, input_size, 1),
        "conv0": conv_init(ks[1], input_size, input_size, 3),
        "conv1": conv_init(ks[2], input_size, input_size, 3),
        "conv2": conv_init(ks[3], input_size, hidden_size, 3),
        "down1": conv_init(ks[4], input_size, hidden_size, ksz),
        "down2": conv_init(ks[5], input_size, input_size, ksz),
    }


def film_init(key, input_size, output_size, max_iter):
    ks = jax.random.split(key, 3)
    return {
        "input_conv": conv_init(ks[0], input_size, input_size, 3),
        "output_conv_1": conv_init(ks[1], input_size, output_size, 3),
        "output_conv_2": conv_init(ks[2], input_size, output_size, 3),
        "pos_embs": sinusoidal_pos_embs(input_size, max_iter),
    }


def ublock_init(key, input_size, hidden_size):
    ks = jax.random.split(key, 5)
    return {
        "block1": conv_init(ks[0], input_size, hidden_size, 1),
        "block2_0": conv_init(ks[1], input_size, hidden_size, 3),
        "block2_1": conv_init(ks[2], hidden_size, hidden_size, 3),
        "block3_0": conv_init(ks[3], hidden_size, hidden_size, 3),
        "block3_1": conv_init(ks[4], hidden_size, hidden_size, 3),
    }


# Architecture constants (fixed by Generator.__init__); memory_efficient=False.
DOWN_SPECS = [(32, 128, 2), (128, 128, 2), (128, 256, 3), (256, 512, 5)]
FILM_SPECS = [(32, 128), (128, 128), (128, 256), (256, 512), (512, 512)]
UP_SPECS = [(768, 512, 5, (1, 2, 1, 2)), (512, 512, 5, (1, 2, 1, 2)),
            (512, 256, 3, (1, 2, 4, 8)), (256, 128, 2, (1, 2, 4, 8)),
            (128, 128, 2, (1, 2, 4, 8))]


def generator_init(key, num_iteration):
    ks = jax.random.split(key, 17)
    return {
        "down0": conv_init(ks[0], 1, 32, 5),
        "dblocks": [dblock_init(ks[1 + i], *DOWN_SPECS[i]) for i in range(4)],
        "films": [film_init(ks[5 + i], FILM_SPECS[i][0], FILM_SPECS[i][1],
                            num_iteration) for i in range(5)],
        "ublocks": [ublock_init(ks[10 + i], UP_SPECS[i][0], UP_SPECS[i][1])
                    for i in range(5)],
        "first_conv": conv_init(ks[15], 128, 768, 3),
        "last_conv": conv_init(ks[16], 128, 1, 3),
    }


def pack_generator_params(raw, cd=COMPUTE_DTYPE):
    """One-time re-layout of all weights into kernel-ready form (hoisted out of
    the forward pass: tap folding, polyphase folding, FiLM output concat)."""
    def pc(p):
        return pack_conv(p, cd)

    packed = {
        "down0": pc(raw["down0"]),
        "dblocks": [],
        "films": [],
        "ublocks": [],
        "first_conv": pc(raw["first_conv"]),
        "last_conv": pc(raw["last_conv"]),
    }
    for i, (_, _, factor) in enumerate(DOWN_SPECS):
        d = raw["dblocks"][i]
        packed["dblocks"].append({
            "residual_dense": pc(d["residual_dense"]),
            "conv0": pc(d["conv0"]), "conv1": pc(d["conv1"]),
            "conv2": pc(d["conv2"]),
            "down1": pack_strided_conv(d["down1"], factor, cd),
            "down2": pack_strided_conv(d["down2"], factor, cd),
        })
    for f in raw["films"]:
        wcat = {"w": jnp.concatenate([f["output_conv_1"]["w"],
                                      f["output_conv_2"]["w"]], axis=0),
                "b": jnp.concatenate([f["output_conv_1"]["b"],
                                      f["output_conv_2"]["b"]], axis=0)}
        packed["films"].append({"input_conv": pc(f["input_conv"]),
                                "output": pc(wcat),
                                "pos": f["pos_embs"].astype(jnp.float32)})
    for u in raw["ublocks"]:
        packed["ublocks"].append(
            {k: pc(u[k]) for k in ("block1", "block2_0", "block2_1",
                                   "block3_0", "block3_1")})
    return packed


# ----------------------------------------------------------------------------
# Forward passes (activations stay in the padded NTL layout; logical lengths
# are tracked explicitly; the final slice happens once on the network output).
# ----------------------------------------------------------------------------
def dblock_forward(p, x, L, factor):
    ksz = factor // 2 * 2 + 1
    pad = ksz // 2
    Lo = (L + 2 * pad - ksz) // factor + 1
    residual = conv1d(x, p["residual_dense"], in_len=L, trim=False)       # 1x1
    residual = conv1d_strided(residual, p["down1"], stride=factor, padding=pad,
                              ksize=ksz, in_len=L, trim=False)
    x = conv1d_strided(x, p["down2"], stride=factor, padding=pad,
                       ksize=ksz, in_len=L, trim=False)
    x = conv1d(x, p["conv0"], dilation=1, padding=1, pre_leaky=True,
               in_len=Lo, trim=False)
    x = conv1d(x, p["conv1"], dilation=2, padding=2, pre_leaky=True,
               in_len=Lo, trim=False)
    x = conv1d(x, p["conv2"], dilation=4, padding=4, pre_leaky=True,
               residual=residual, in_len=Lo, trim=False)                  # + res
    return x, Lo


def film_forward(p, x, L, t):
    # input_conv with fused "leaky then +pos" epilogue.
    x = conv1d(x, p["input_conv"], padding=1, epilogue="leaky_pos",
               pos=p["pos"][t], in_len=L, trim=False)
    # output_conv_1 / output_conv_2 fused into one conv over concatenated Cout:
    # result channels [0:C) = shift, [C:2C) = scale; kept in padded layout.
    return conv1d(x, p["output"], padding=1, in_len=L, trim=False)


def ublock_forward(p, x, L, filmcat, factor, dilation):
    # TODO(synk): fold the nearest-neighbour repeat (l // factor) into the conv
    # input gather (polyphase) instead of materializing `up` in HBM.
    up = jnp.repeat(x, factor, axis=-1)          # tail beyond L*factor stays zero
    Lu = L * factor
    # block1 (1x1) + block2[0] (pre-leaky commutes with nearest interp) + FiLM
    # + leaky fused into ONE pass over `up`.
    block2, block1 = conv1d(up, p["block2_0"], dilation=dilation[0],
                            padding=dilation[0], pre_leaky=True, film=filmcat,
                            epilogue="film", head1x1=p["block1"],
                            in_len=Lu, trim=False)
    # x = block1 + block2[1](block2); also emit leaky(shift + scale*x) for block3.
    x2, block3 = conv1d(block2, p["block2_1"], dilation=dilation[1],
                        padding=dilation[1], residual=block1, film=filmcat,
                        extra_film_out=True, in_len=Lu, trim=False)
    block3 = conv1d(block3, p["block3_0"], dilation=dilation[2],
                    padding=dilation[2], film=filmcat, epilogue="film",
                    in_len=Lu, trim=False)
    x = conv1d(block3, p["block3_1"], dilation=dilation[3],
               padding=dilation[3], residual=x2, in_len=Lu, trim=False)   # x+block3
    return x, Lu


def generator_forward(params, y_t, log_mel_spec, t):
    Lw = y_t.shape[-1]
    Fr = log_mel_spec.shape[-1]
    # ------- downsample path on the noisy waveform -------
    x = conv1d(y_t, params["down0"], padding=2, trim=False)               # (B,32,·)
    L = Lw
    films = [film_forward(params["films"][0], x, L, t)]
    for i in range(4):
        x, L = dblock_forward(params["dblocks"][i], x, L, DOWN_SPECS[i][2])
        films.append(film_forward(params["films"][i + 1], x, L, t))
    # ------- upsample path on the log-mel spectrogram -------
    x = conv1d(log_mel_spec, params["first_conv"], padding=1, trim=False)
    L = Fr
    for i, filmcat in enumerate(reversed(films)):
        _, _, factor, dil = UP_SPECS[i]
        x, L = ublock_forward(params["ublocks"][i], x, L, filmcat, factor, dil)
    x = conv1d(x, params["last_conv"], padding=1, in_len=L, trim=True)    # (B,1,L)
    return x.astype(jnp.float32)


# ----------------------------------------------------------------------------
# Pure-lax reference (float32) for end-to-end validation.
# ----------------------------------------------------------------------------
def _ref_conv(x, p, *, dilation=1, padding=0, stride=1):
    y = lax.conv_general_dilated(
        x.astype(jnp.float32), p["w"], (stride,), [(padding, padding)],
        rhs_dilation=(dilation,), dimension_numbers=("NCH", "OIH", "NCH"))
    return y + p["b"][None, :, None]


def _ref_dblock(p, x, factor):
    ksz = factor // 2 * 2 + 1
    pad = ksz // 2
    residual = _ref_conv(x, p["residual_dense"])
    residual = _ref_conv(residual, p["down1"], stride=factor, padding=pad)
    x = _ref_conv(x, p["down2"], stride=factor, padding=pad)
    for name, d in (("conv0", 1), ("conv1", 2), ("conv2", 4)):
        x = _ref_conv(_leaky(x), p[name], dilation=d, padding=d)
    return x + residual


def _ref_film(p, x, t):
    x = _ref_conv(x, p["input_conv"], padding=1)
    x = _leaky(x) + p["pos_embs"][t][None, :, None]
    shift = _ref_conv(x, p["output_conv_1"], padding=1)
    scale = _ref_conv(x, p["output_conv_2"], padding=1)
    return shift, scale


def _ref_ublock(p, x, shift, scale, factor, dilation):
    up = jnp.repeat(x, factor, axis=-1)
    block1 = _ref_conv(up, p["block1"])
    block2 = jnp.repeat(_leaky(x), factor, axis=-1)
    block2 = _ref_conv(block2, p["block2_0"], dilation=dilation[0],
                       padding=dilation[0])
    block2 = _leaky(shift + scale * block2)
    block2 = _ref_conv(block2, p["block2_1"], dilation=dilation[1],
                       padding=dilation[1])
    x = block1 + block2
    block3 = _leaky(shift + scale * x)
    block3 = _ref_conv(block3, p["block3_0"], dilation=dilation[2],
                       padding=dilation[2])
    block3 = _leaky(shift + scale * block3)
    block3 = _ref_conv(block3, p["block3_1"], dilation=dilation[3],
                       padding=dilation[3])
    return x + block3


def _ref_generator(raw, y_t, mel, t):
    x = _ref_conv(y_t, raw["down0"], padding=2)
    films = [_ref_film(raw["films"][0], x, t)]
    for i in range(4):
        x = _ref_dblock(raw["dblocks"][i], x, DOWN_SPECS[i][2])
        films.append(_ref_film(raw["films"][i + 1], x, t))
    x = _ref_conv(mel, raw["first_conv"], padding=1)
    for i, (shift, scale) in enumerate(reversed(films)):
        _, _, factor, dil = UP_SPECS[i]
        x = _ref_ublock(raw["ublocks"][i], x, shift, scale, factor, dil)
    return _ref_conv(x, raw["last_conv"], padding=1)


# ----------------------------------------------------------------------------
# Correctness checks for the Pallas conv paths (float32 vs lax).
# ----------------------------------------------------------------------------
def _check_conv_primitives():
    k = jax.random.PRNGKey(42)
    k1, k2, k3, k4, k5, k6, k7 = jax.random.split(k, 7)
    f32 = jnp.float32

    def ref_conv(x, p, d=1, pad=0, stride=1):
        return _ref_conv(x, p, dilation=d, padding=pad, stride=stride)

    # Dilated, single-tile path (exercises lane rounding + batch folding).
    x = jax.random.normal(k1, (2, 8, 40), f32)
    p = {"w": jax.random.normal(k2, (16, 8, 3), f32),
         "b": jax.random.normal(k3, (16,), f32)}
    got = conv1d(x, pack_conv(p, f32), dilation=2, padding=2)
    assert jnp.allclose(got, ref_conv(x, p, d=2, pad=2),
                        rtol=2e-2, atol=2e-3), "dilated conv mismatch"

    # Tiled (halo) path.
    Lbig = MAX_TL + 173
    xl = jax.random.normal(k4, (1, 8, Lbig), f32)
    got = conv1d(xl, pack_conv(p, f32), dilation=2, padding=2)
    assert jnp.allclose(got, ref_conv(xl, p, d=2, pad=2),
                        rtol=2e-2, atol=2e-3), "tiled conv mismatch"

    # Strided (polyphase-folded) path.
    got = conv1d_strided(x, pack_strided_conv(p, 2, f32),
                         stride=2, padding=1, ksize=3)
    assert jnp.allclose(got, ref_conv(x, p, stride=2, pad=1),
                        rtol=2e-2, atol=2e-3), "strided conv mismatch"

    # Cin == 1 VPU path.
    x1 = jax.random.normal(k1, (1, 1, 300), f32)
    p1 = {"w": jax.random.normal(k2, (8, 1, 5), f32),
          "b": jax.random.normal(k3, (8,), f32)}
    got = conv1d(x1, pack_conv(p1, f32), padding=2)
    assert jnp.allclose(got, ref_conv(x1, p1, pad=2),
                        rtol=2e-2, atol=2e-3), "cin=1 conv mismatch"

    # Padded-layout chaining: trim=False outputs (tail-zero invariant) consumed
    # as main input, residual and FiLM of a fused conv; single- and multi-tile.
    pa = {"w": jax.random.normal(k5, (16, 8, 3), f32),
          "b": jax.random.normal(k3, (16,), f32)}
    pr = {"w": jax.random.normal(k6, (8, 8, 1), f32), "b": jnp.zeros((8,), f32)}
    pf = {"w": jax.random.normal(k7, (16, 8, 3), f32), "b": jnp.zeros((16,), f32)}
    pb = {"w": jax.random.normal(k2, (8, 16, 3), f32),
          "b": jax.random.normal(k3, (8,), f32)}
    ph = {"w": jax.random.normal(k6, (12, 16, 1), f32),
          "b": jax.random.normal(k7, (12,), f32)}
    for L in (200, MAX_TL + 173):
        xc = jax.random.normal(k4, (2, 8, L), f32)
        a = conv1d(xc, pack_conv(pa, f32), padding=1, trim=False)
        r = conv1d(xc, pack_conv(pr, f32), trim=False)
        fcat = conv1d(xc, pack_conv(pf, f32), padding=1, trim=False)
        got, goth = conv1d(a, pack_conv(pb, f32), dilation=2, padding=2,
                           pre_leaky=True, residual=r, film=fcat,
                           epilogue="film", head1x1=pack_conv(ph, f32),
                           in_len=L, trim=True)
        a_ref = ref_conv(xc, pa, pad=1)
        r_ref = ref_conv(xc, pr)
        f_ref = ref_conv(xc, pf, pad=1)
        sh, sc = f_ref[:, :8], f_ref[:, 8:]
        y_ref = ref_conv(_leaky(a_ref), pb, d=2, pad=2) + r_ref
        y_ref = _leaky(sh + sc * y_ref)
        h_ref = ref_conv(a_ref, ph)
        assert jnp.allclose(got, y_ref, rtol=2e-2, atol=2e-3), \
            f"chained film conv mismatch L={L}"
        assert jnp.allclose(goth, h_ref, rtol=2e-2, atol=2e-3), \
            f"fused head mismatch L={L}"
        got2, extra2 = conv1d(a, pack_conv(pb, f32), dilation=1, padding=1,
                              residual=r, film=fcat, extra_film_out=True,
                              in_len=L, trim=True)
        y2_ref = ref_conv(a_ref, pb, d=1, pad=1) + r_ref
        e2_ref = _leaky(sh + sc * y2_ref)
        assert jnp.allclose(got2, y2_ref, rtol=2e-2, atol=2e-3), \
            f"residual conv mismatch L={L}"
        assert jnp.allclose(extra2, e2_ref, rtol=2e-2, atol=2e-3), \
            f"extra film output mismatch L={L}"


if __name__ == "__main__":
    _check_conv_primitives()

    key = jax.random.PRNGKey(0)
    kp, ky, km = jax.random.split(key, 3)

    num_iteration = 5
    t = 3
    assert 0 <= t < num_iteration
    bs, num_frame = 2, 2                                # small, consistent shapes

    raw_params = generator_init(kp, num_iteration)
    packed = pack_generator_params(raw_params, COMPUTE_DTYPE)
    y_t = 0.1 * jax.random.normal(ky, (bs, 1, num_frame * 300), jnp.float32)
    log_mel_spec = 0.1 * jax.random.normal(km, (bs, 128, num_frame), jnp.float32)

    fwd = jax.jit(generator_forward, static_argnums=(3,))
    n_hat = jax.block_until_ready(fwd(packed, y_t, log_mel_spec, t))

    assert n_hat.shape == (bs, 1, num_frame * 300), n_hat.shape
    assert bool(jnp.all(jnp.isfinite(n_hat)))

    # End-to-end sanity of the bf16 Pallas path against a pure-lax f32 reference
    # (loose tolerance: ~35 serial bf16 conv layers).
    ref = jax.jit(_ref_generator, static_argnums=(3,))(raw_params, y_t,
                                                       log_mel_spec, t)
    err = float(jnp.max(jnp.abs(n_hat - ref)) / (jnp.max(jnp.abs(ref)) + 1e-12))
    assert err < 0.4, f"bf16 end-to-end mismatch vs f32 reference: {err}"

    print("KERNEL_OK")
</pallas_src>

<mosaic_0001>
module attributes {stable_mosaic.version = 11 : i64} {
  func.func @_conv_kernel(%arg0: i32, %arg1: i32, %arg2: memref<2x8x132xf32, #tpu.memory_space<vmem>>, %arg3: memref<16x24xf32, #tpu.memory_space<vmem>>, %arg4: memref<16x1xf32, #tpu.memory_space<vmem>>, %arg5: memref<2x16x128xf32, #tpu.memory_space<vmem>>) attributes {dimension_semantics = [#tpu.dimension_semantics<parallel>, #tpu.dimension_semantics<parallel>], iteration_bounds = array<i64: 1, 1>, scalar_prefetch = 0 : i64, scratch_operands = 0 : i64, tpu.core_type = #tpu.core_type<tc>, window_params = [{transform_indices = @transform_0, window_bounds = array<i64: 2, 8, 132>}, {pipeline_mode = #tpu.pipeline_mode<synchronous>, transform_indices = @transform_1, window_bounds = array<i64: 16, 24>}, {pipeline_mode = #tpu.pipeline_mode<synchronous>, transform_indices = @transform_2, window_bounds = array<i64: 16, 1>}, {transform_indices = @transform_3, window_bounds = array<i64: 2, 16, 128>}]} {
    %c128_i32 = arith.constant 128 : i32
    %0 = arith.muli %arg1, %c128_i32 : i32
    %c40_i32 = arith.constant 40 : i32
    %1 = arith.subi %c40_i32, %0 : i32
    %2 = tpu.iota {dimensions = array<i32: 1>} : vector<1x128xi32>
    %3 = vector.broadcast %1 : i32 to vector<1x128xi32>
    %4 = arith.cmpi slt, %2, %3 : vector<1x128xi32>
    %c0 = arith.constant 0 : index
    %c0_0 = arith.constant 0 : index
    %c0_1 = arith.constant 0 : index
    %5 = vector.load %arg2[%c0, %c0_0, %c0_1] : memref<2x8x132xf32, #tpu.memory_space<vmem>>, vector<1x8x132xf32>
    %6 = vector.shape_cast %5 : vector<1x8x132xf32> to vector<8x132xf32>
    %7 = vector.extract_strided_slice %6 {offsets = [0, 0], sizes = [8, 128], strides = [1, 1]} : vector<8x132xf32> to vector<8x128xf32>
    %8 = vector.extract_strided_slice %6 {offsets = [0, 2], sizes = [8, 128], strides = [1, 1]} : vector<8x132xf32> to vector<8x128xf32>
    %9 = vector.extract_strided_slice %6 {offsets = [0, 4], sizes = [8, 128], strides = [1, 1]} : vector<8x132xf32> to vector<8x128xf32>
    %10 = tpu.concatenate %7, %8, %9 in 0 : vector<8x128xf32>, vector<8x128xf32>, vector<8x128xf32> -> vector<24x128xf32>
    %c0_2 = arith.constant 0 : index
    %c0_3 = arith.constant 0 : index
    %11 = vector.load %arg3[%c0_2, %c0_3] : memref<16x24xf32, #tpu.memory_space<vmem>>, vector<16x24xf32>
    %cst = arith.constant dense<0.000000e+00> : vector<16x128xf32>
    %12 = tpu.matmul %11, %10, %cst {dimension_numbers = #tpu.dot_dimension_numbers<[1], [0], [0], [1], [0, 0, 1, 1], [], []>} : vector<16x24xf32>, vector<24x128xf32>, vector<16x128xf32> -> vector<16x128xf32>
    %c0_4 = arith.constant 0 : index
    %c0_5 = arith.constant 0 : index
    %13 = vector.load %arg4[%c0_4, %c0_5] : memref<16x1xf32, #tpu.memory_space<vmem>>, vector<16x1xf32>
    %14 = vector.broadcast %13 : vector<16x1xf32> to vector<16x128xf32>
    %15 = arith.addf %12, %14 : vector<16x128xf32>
    %cst_6 = arith.constant 0.000000e+00 : f32
    %16 = vector.shape_cast %4 : vector<1x128xi1> to vector<1x128xi1>
    %17 = vector.broadcast %16 : vector<1x128xi1> to vector<16x128xi1>
    %18 = vector.broadcast %cst_6 : f32 to vector<16x128xf32>
    %19 = arith.select %17, %15, %18 : vector<16x128xi1>, vector<16x128xf32>
    %c0_7 = arith.constant 0 : index
    %c0_8 = arith.constant 0 : index
    %c0_9 = arith.constant 0 : index
    %20 = vector.load %arg5[%c0_7, %c0_8, %c0_9] : memref<2x16x128xf32, #tpu.memory_space<vmem>>, vector<1x16x128xf32>
    %21 = vector.shape_cast %20 : vector<1x16x128xf32> to vector<16x128xf32>
    %22 = vector.shape_cast %19 : vector<16x128xf32> to vector<1x16x128xf32>
    tpu.vector_store %arg5[%c0_7, %c0_8, %c0_9], %22 {strides = array<i32>} : memref<2x16x128xf32, #tpu.memory_space<vmem>>, vector<1x16x128xf32>,
    %c1 = arith.constant 1 : index
    %c0_10 = arith.constant 0 : index
    %c0_11 = arith.constant 0 : index
    %23 = vector.load %arg2[%c1, %c0_10, %c0_11] : memref<2x8x132xf32, #tpu.memory_space<vmem>>, vector<1x8x132xf32>
    %24 = vector.shape_cast %23 : vector<1x8x132xf32> to vector<8x132xf32>
    %25 = vector.extract_strided_slice %24 {offsets = [0, 0], sizes = [8, 128], strides = [1, 1]} : vector<8x132xf32> to vector<8x128xf32>
    %26 = vector.extract_strided_slice %24 {offsets = [0, 2], sizes = [8, 128], strides = [1, 1]} : vector<8x132xf32> to vector<8x128xf32>
    %27 = vector.extract_strided_slice %24 {offsets = [0, 4], sizes = [8, 128], strides = [1, 1]} : vector<8x132xf32> to vector<8x128xf32>
    %28 = tpu.concatenate %25, %26, %27 in 0 : vector<8x128xf32>, vector<8x128xf32>, vector<8x128xf32> -> vector<24x128xf32>
    %c0_12 = arith.constant 0 : index
    %c0_13 = arith.constant 0 : index
    %29 = vector.load %arg3[%c0_12, %c0_13] : memref<16x24xf32, #tpu.memory_space<vmem>>, vector<16x24xf32>
    %cst_14 = arith.constant dense<0.000000e+00> : vector<16x128xf32>
    %30 = tpu.matmul %29, %28, %cst_14 {dimension_numbers = #tpu.dot_dimension_numbers<[1], [0], [0], [1], [0, 0, 1, 1], [], []>} : vector<16x24xf32>, vector<24x128xf32>, vector<16x128xf32> -> vector<16x128xf32>
    %c0_15 = arith.constant 0 : index
    %c0_16 = arith.constant 0 : index
    %31 = vector.load %arg4[%c0_15, %c0_16] : memref<16x1xf32, #tpu.memory_space<vmem>>, vector<16x1xf32>
    %32 = vector.broadcast %31 : vector<16x1xf32> to vector<16x128xf32>
    %33 = arith.addf %30, %32 : vector<16x128xf32>
    %cst_17 = arith.constant 0.000000e+00 : f32
    %34 = vector.shape_cast %4 : vector<1x128xi1> to vector<1x128xi1>
    %35 = vector.broadcast %34 : vector<1x128xi1> to vector<16x128xi1>
    %36 = vector.broadcast %cst_17 : f32 to vector<16x128xf32>
    %37 = arith.select %35, %33, %36 : vector<16x128xi1>, vector<16x128xf32>
    %c1_18 = arith.constant 1 : index
    %c0_19 = arith.constant 0 : index
    %c0_20 = arith.constant 0 : index
    %38 = vector.load %arg5[%c1_18, %c0_19, %c0_20] : memref<2x16x128xf32, #tpu.memory_space<vmem>>, vector<1x16x128xf32>
    %39 = vector.shape_cast %38 : vector<1x16x128xf32> to vector<16x128xf32>
    %40 = vector.shape_cast %37 : vector<16x128xf32> to vector<1x16x128xf32>
    tpu.vector_store %arg5[%c1_18, %c0_19, %c0_20], %40 {strides = array<i32>} : memref<2x16x128xf32, #tpu.memory_space<vmem>>, vector<1x16x128xf32>,
    return
  }
  func.func @transform_0(%arg0: i32, %arg1: i32) -> (i32, i32, i32) {
    %c0_i32 = arith.constant 0 : i32
    %c0_i32_0 = arith.constant 0 : i32
    %c0_i32_1 = arith.constant 0 : i32
    return %arg0, %c0_i32, %c0_i32_0 : i32, i32, i32
  }
  func.func @transform_1(%arg0: i32, %arg1: i32) -> (i32, i32) {
    %c0_i32 = arith.constant 0 : i32
    %c0_i32_0 = arith.constant 0 : i32
    %c0_i32_1 = arith.constant 0 : i32
    return %c0_i32, %c0_i32_0 : i32, i32
  }
  func.func @transform_2(%arg0: i32, %arg1: i32) -> (i32, i32) {
    %c0_i32 = arith.constant 0 : i32
    %c0_i32_0 = arith.constant 0 : i32
    %c0_i32_1 = arith.constant 0 : i32
    return %c0_i32, %c0_i32_0 : i32, i32
  }
  func.func @transform_3(%arg0: i32, %arg1: i32) -> (i32, i32, i32) {
    %c0_i32 = arith.constant 0 : i32
    %c0_i32_0 = arith.constant 0 : i32
    return %arg0, %c0_i32, %arg1 : i32, i32, i32
  }
}

</mosaic_0001>

<bundles_post_ra>
// kernel: tpu_custom_call.1
= control target key start
LH: loop header
LB: loop body
LE: loop exit
PB: predicated region body
PF: predicated region fallthrough
CT: control target
= control target key end

     0   :  { %8 = vsyncpa [#allocation3], 0  ;;  %s471_s0 = inlined_call_operand.hbm [shape: f32[2,8,132], index: 0, kind: input, shape index: {}]   ;;  %s472_s1 = inlined_call_operand.vmem [shape: f32[16,24], index: 1, kind: input, shape index: {}]   ;;  %s473_s2 = inlined_call_operand.vmem [shape: f32[16,1], index: 2, kind: input, shape index: {}]   ;;  %s474_s3 = inlined_call_operand.hbm [shape: f32[2,16,128], index: 3, kind: output, shape index: {}]  }
   0x1   :  { %9 = vsyncpa [#allocation4], 0  ;;  %s398_s12 = smov [#allocation2]   ;;  %s350_s16 = scalar_lea.hbm %s471_s0, 512 }
   0x2   :  { %s15_s13 = sshll.u32 %s398_s12, 4  ;;  %p351_p0 = scmp.ne.s32.totalorder %s471_s0, %s350_s16  ;;  %s16_s13 = int_to_ptr.vmem [resolvable:$true] %s15_s13 }
   0x3   :  { %p354_p1 = scmp.lt.u32.totalorder %s350_s16, %s471_s0 }
   0x5   :  { %p356_p2 = pnand %p354_p1, %p351_p0 }
   0x7   :  { %359 = shalt.err (!%p356_p2)
}
   0x8   :  { %s360_s21 = scalar_lea.vmem %s16_s13, 512  ;;  %p365_p4 = scmp.lt.s32.totalorder %s16_s13, %s16_s13 }
   0x9   :  { %p361_p3 = scmp.ne.s32.totalorder %s16_s13, %s360_s21  ;;  %p366_p5 = scmp.lt.s32.totalorder %s360_s21, %s360_s21 }
   0xb   :  { %p367_p6 = por %p366_p5, %p365_p4 }
   0xd   :  { %p368_p7 = pnand %p367_p6, %p361_p3 }
   0xf   :  { %371 = shalt.err (!%p368_p7)
}
  0x10   :  { %s399_s22 = smov 256   ;;  %s400_s23 = smov 16  }
  0x11   :  { %21 = dma.hbm_to_vmem [thread:$0]  %s471_s0, 512, %s16_s13, [#allocation3], %s399_s22, %s399_s22, %s400_s23  }
  0x12   :  { %394 = dma.done.wait [#allocation3], 512  }
  0x13   :  { %395 = vsyncadd [#allocation3], 4294966784  ;;  %vm67_vm0 = vcmask 195584   ;;  %v35_v0 = vld [vmem:[#allocation2] sm:$0xff]  ;;  %v36_v1 = vld [vmem:[#allocation2 + $0x8] sm:$0xff]  ;;  %s401_s26 = smov 124   ;;  %v31_v27 = vlaneseq }
  0x14   :  { %v156_v2 = vld [vmem:[#allocation2 + $0x10] sm:$0xff]  ;;  %46 = vrot.lane.b32.xlu1 %v35_v0, %s401_s26  ;;  %v338_v3 = vpack.i.bf16 %v36_v1, %v35_v0  ;;  %v157_v4 = vld [vmem:[#allocation2 + $0x18] sm:$0xff]  ;;  %v53_v5 = vld [vmem:[%s472_s1] sm:$0xff]  ;;  %s402_s29 = smov 126   ;;  %v403_v7 = vmov 0   ;;  %vm43_vm1 = vcmask 1031168  }
  0x15   :  { %309 = vmatprep.mubr.msk.f32.mxu0 %vm67_vm0, %v53_v5  ;;  %318 = vmatprep.mubr.msk.f32.mxu1 %vm67_vm0, %v53_v5  ;;  %v343_v6 = vpack.i.bf16 %v157_v4, %v156_v2  ;;  %v56_v8 = vld [vmem:[%s473_s2 + $0x8] sm:$0xff]  ;;  %v55_v9 = vld [vmem:[%s473_s2] sm:$0xff]  ;;  %vm50_vm2 = vcmask 1014784   ;;  %v32_v28 = vand.u32 127, %v31_v27 }
  0x16   :  { %339 = vrot.lane.b32.xlu0 %v338_v3, %s402_s29  ;;  %349 = vset.pattern.permute.xlu1 %v403_v7  ;;  %v54_v25 = vld [vmem:[%s472_s1 + $0x8] sm:$0xff]  ;;  %s404_s1 = smov [#allocation5]  }
  0x17   :  { %348 = vset.pattern.permute.xlu0 %v403_v7  ;;  %vm34_vm3 = vcmp.lt.s32.totalorder %v32_v28, 40  ;;  %s277_s7 = sshll.u32 %s404_s1, 4  ;;  %s278_s7 = int_to_ptr.vmem [resolvable:$true] %s277_s7 }
  0x18   :  { %48 = vrot.lane.b32.xlu1 %v36_v1, %s401_s26  ;;  %s372_s8 = scalar_lea.vmem %s278_s7, 512  ;;  %p377_p9 = scmp.lt.s32.totalorder %s278_s7, %s278_s7 }
  0x19   :  { %p373_p8 = scmp.ne.s32.totalorder %s278_s7, %s372_s8  ;;  %p378_p10 = scmp.lt.s32.totalorder %s372_s8, %s372_s8 }
  0x1a   :  { %344 = vrot.lane.b32.xlu0 %v343_v6, %s402_s29 }
  0x1b   :  { %p379_p11 = por %p378_p10, %p377_p9 }
  0x1c   :  { %168 = vrot.lane.b32.xlu1 %v157_v4, %s401_s26 }
  0x1d   :  { %p380_p12 = pnand %p379_p11, %p373_p8 }
  0x1e   :  { %166 = vrot.lane.b32.xlu0 %v156_v2, %s401_s26 }
  0x20   :  { %64 = vperm.xlu1 %349, %v56_v8  }
  0x22   :  { %59 = vperm.xlu0 %348, %v55_v9  }
  0x24   :  { %178 = vperm.xlu1 %349, %v55_v9  }
  0x26   :  { %183 = vperm.xlu0 %348, %v56_v8  }
  0x86   :  { %v47_v10 = vpop.permute.xlu1 %46 }
  0x88   :  { %v340_v11 = vpop.permute.xlu0 %339 }
  0x89   :  { %v342_v12 = vunpack.i.h.bf16 %v340_v11  ;;  %v341_v13 = vunpack.i.l.bf16 %v340_v11 }
  0x8a   :  { %v49_v14 = vpop.permute.xlu1 %48 }
  0x8b   :  { %v44_v15 = vsel %vm43_vm1, %v341_v13, %v342_v12  ;;  %v51_v21 = vsel %vm50_vm2, %v47_v10, %v49_v14 }
  0x8c   :  { %v345_v16 = vpop.permute.xlu0 %344  ;;  %v321_v17 = vpack.c.bf16 %v44_v15, %v35_v0 }
  0x8d   :  { %v347_v18 = vunpack.i.h.bf16 %v345_v16  ;;  %v346_v19 = vunpack.i.l.bf16 %v345_v16 }
  0x8e   :  { %322 = vmatprep.subr.bf16.mxu0 %v321_v17  ;;  %v169_v20 = vpop.permute.xlu1 %168 }
  0x8f   :  { %324 = vmatpush3.bf16.msra.mxu0 %v321_v17  ;;  %v164_v22 = vsel %vm43_vm1, %v346_v19, %v347_v18 }
  0x90   :  { %307 = vmatprep.subr.mxu0 %v51_v21  ;;  %v325_v23 = vpack.c.bf16 %v164_v22, %v156_v2  ;;  %v167_v24 = vpop.permute.xlu0 %166 }
  0x91   :  { %v170_v26 = vsel %vm50_vm2, %v167_v24, %v169_v20 }
  0x92   :  { %326 = vmatprep.subr.bf16.mxu1 %v325_v23 }
  0x93   :  { %308 = vmatpush3.msra.mxu0 %v51_v21  ;;  %328 = vmatpush3.bf16.msra.mxu1 %v325_v23 }
  0x94   :  { %310 = vmatmul.mubr.msk.f32.vlgmr.msra.gmra.mrb[0].mxu0 %vm67_vm0, %v54_v25  ;;  %316 = vmatprep.subr.mxu1 %v170_v26 }
  0x97   :  { %317 = vmatpush3.msra.mxu1 %v170_v26 }
  0x98   :  { %319 = vmatmul.mubr.msk.f32.vlgmr.msra.gmra.mrb[0].mxu1 %vm67_vm0, %v54_v25 }
  0x9f   :  { %v65_v30 = vpop.permute.xlu1 %64 }
  0xa1   :  { %v60_v29 = vpop.permute.xlu0 %59 }
  0xa3   :  { %v179_v39 = vpop.permute.xlu1 %178 }
  0xa5   :  { %v184_v36 = vpop.permute.xlu0 %183 }
 0x167   :  { %v311_v31 = vpop.f32.mrb[0].mxu0 }
 0x168   :  { %v146_v32 = vadd.f32 %v311_v31, %v65_v30  ;;  %v140_v33 = vpop.f32.mrb[1].mxu0 }
 0x169   :  { %v141_v34 = vadd.f32 %v140_v33, %v60_v29 }
 0x16a   :  { %v152_v35 = vsel %vm34_vm3, %v146_v32, 0.0 }
 0x16b   :  { %154 = vst [vmem:[#allocation5 + $0x8] sm:$0xff] %v152_v35  ;;  %v151_v37 = vsel %vm34_vm3, %v141_v34, 0.0  ;;  %v320_v38 = vpop.f32.mrb[0].mxu1 }
 0x16c   :  { %153 = vst [vmem:[#allocation5] sm:$0xff] %v151_v37  ;;  %v264_v40 = vadd.f32 %v320_v38, %v184_v36  ;;  %v258_v41 = vpop.f32.mrb[1].mxu1 }
 0x16d   :  { %v259_v42 = vadd.f32 %v258_v41, %v179_v39 }
 0x16e   :  { %v268_v43 = vsel %vm34_vm3, %v264_v40, 0.0 }
 0x16f   :  { %271 = vst [vmem:[#allocation5 + $0x18] sm:$0xff] %v268_v43  ;;  %v267_v44 = vsel %vm34_vm3, %v259_v42, 0.0 }
 0x170   :  { %270 = vst [vmem:[#allocation5 + $0x10] sm:$0xff] %v267_v44 }
 0x171   :  { %383 = shalt.err (!%p380_p12)
}
 0x172   :  { %s384_s11 = scalar_lea.hbm %s474_s3, 512 }
 0x173   :  { %p385_p13 = scmp.ne.s32.totalorder %s474_s3, %s384_s11  ;;  %p388_p0 = scmp.lt.u32.totalorder %s384_s11, %s474_s3 }
 0x175   :  { %p390_p1 = pnand %p388_p0, %p385_p13 }
 0x177   :  { %393 = shalt.err (!%p390_p1)
}
 0x178   :  { %s405_s16 = smov 128   ;;  %s406_s17 = smov 8  }
 0x179   :  { %283 = dma.vmem_to_hbm [thread:$0]  %s278_s7, 512, %s474_s3, [#allocation4], %s405_s16, %s405_s16, %s406_s17  }
 0x17a   :  { %396 = dma.done.wait [#allocation4], 512  }
 0x17b   :  { %397 = vsyncadd [#allocation4], 4294966784 }
 0x17c   :  { %287 = vsyncpa [#allocation3], 1 }
 0x17d   :  { %288 = vsyncpa [#allocation4], 1 }

</bundles_post_ra>
